<compile_context>
chip_gen: v5e
topology: v5e:2x2
jax: 0.10.0
libtpu: 0.0.40
codegen_flags: <defaults>
</compile_context>

<pallas_src>
import jax
import jax.numpy as jnp
from jax.experimental import pallas as pl
from jax.experimental.pallas import tpu as pltpu


def mlp_cat_kernel(xi_ref, xj_ref,
                   w0p_ref, w0m_ref, b0_ref,
                   w1_ref, b1_ref,
                   w2_ref, b2_ref,
                   out_ref):
    """Fused 3-layer MLP on both concat orders (branch-stacked rows), averaged."""
    t = xi_ref.shape[0]
    xi = xi_ref[...]
    xj = xj_ref[...]

    # layer 0 via sum/difference trick (see header). No feature concat needed.
    s = xi + xj                                                    # (t, C)
    d = xi - xj                                                    # (t, C)
    u = jnp.dot(s, w0p_ref[...], preferred_element_type=jnp.float32)  # (t, H)
    v = jnp.dot(d, w0m_ref[...], preferred_element_type=jnp.float32)  # (t, H)
    b0 = b0_ref[...]
    h1 = jnp.maximum(u + v + b0, 0.0)   # branch [x_i, x_j]
    h2 = jnp.maximum(u - v + b0, 0.0)   # branch [x_j, x_i]

    # Stack the two branches along the row (sublane) axis so each remaining
    # layer is a single MXU matmul over (2t, H).
    h = jnp.concatenate([h1, h2], axis=0)                          # (2t, H)

    # layer 1: Linear(H -> H) + ReLU (dropout = identity in eval mode).
    h = jnp.dot(h, w1_ref[...], preferred_element_type=jnp.float32) + b1_ref[...]
    h = jnp.maximum(h, 0.0)

    # final layer: Linear(H -> out), no activation; average the two branches.
    y = jnp.dot(h, w2_ref[...], preferred_element_type=jnp.float32) + b2_ref[...]
    # NOTE: out width (e.g. 8) < 128 lanes -> masked vst; accepted (output tiny,
    # padding the output to 128 lanes would 16x the HBM write bytes).
    out_ref[...] = ((y[:t, :] + y[t:, :]) * 0.5).astype(out_ref.dtype)


def mlp_cat_predictor(x_i, x_j, params, *, tile_n=512):
    """params = list of (W_(in,out), b_(1,out)) for each of the 3 layers."""
    (w0, b0), (w1, b1), (w2, b2) = params
    n, c = x_i.shape
    hidden = w1.shape[0]
    out_c = w2.shape[1]

    # Split + fold layer-0 weight so no [x_i, x_j] feature concat (and no
    # row-doubled layer-0 matmul) is ever needed:
    #   relu([x_i, x_j] @ w0 + b0) == relu((x_i+x_j)@wp + (x_i-x_j)@wm + b0)
    w0a = w0[:c]                    # (C, H) — multiplies the "left half"
    w0b = w0[c:]                    # (C, H) — multiplies the "right half"
    w0p = (w0a + w0b) * 0.5
    w0m = (w0a - w0b) * 0.5

    # Row tiling: clamp tile to the (padded) problem size, pad N to a multiple.
    tile_n = min(tile_n, ((n + 7) // 8) * 8)
    n_pad = pl.cdiv(n, tile_n) * tile_n
    if n_pad != n:
        x_i = jnp.pad(x_i, ((0, n_pad - n), (0, 0)))
        x_j = jnp.pad(x_j, ((0, n_pad - n), (0, 0)))
    grid = (n_pad // tile_n,)

    row_spec = pl.BlockSpec((tile_n, c), lambda i: (i, 0))
    const = lambda shape: pl.BlockSpec(shape, lambda i: (0, 0))  # VMEM-resident

    # Advisory cost hint for the XLA scheduler.
    flops = (2 * 2 * n_pad * c * hidden          # layer 0 (sum/diff form)
             + 2 * (2 * n_pad) * hidden * hidden  # layer 1 (both branches)
             + 2 * (2 * n_pad) * hidden * out_c)  # layer 2 (both branches)
    bytes_accessed = 4 * (2 * n_pad * c + n_pad * out_c
                          + w0.size + w1.size + w2.size
                          + b0.size + b1.size + b2.size)

    out = pl.pallas_call(
        mlp_cat_kernel,
        out_shape=jax.ShapeDtypeStruct((n_pad, out_c), jnp.float32),
        grid=grid,
        in_specs=[
            row_spec, row_spec,
            const((c, hidden)), const((c, hidden)), const((1, hidden)),
            const((hidden, hidden)), const((1, hidden)),
            const((hidden, out_c)), const((1, out_c)),
        ],
        out_specs=pl.BlockSpec((tile_n, out_c), lambda i: (i, 0)),
        compiler_params=pltpu.CompilerParams(
            dimension_semantics=("parallel",),
            vmem_limit_bytes=32 * 1024 * 1024,
        ),
        cost_estimate=pl.CostEstimate(
            flops=flops, transcendentals=0, bytes_accessed=bytes_accessed),
    )(x_i, x_j, w0p, w0m, b0, w1, b1, w2, b2)

    return out[:n]


def init_params(key, in_channels, hidden_channels, out_channels, num_layers):
    """Deterministic synthetic init (uniform, PyTorch-Linear-style bounds)."""
    in_channels = 2 * in_channels
    params = []
    for i in range(num_layers):
        first = in_channels if i == 0 else hidden_channels
        second = out_channels if i == num_layers - 1 else hidden_channels
        key, kw, kb = jax.random.split(key, 3)
        bound = 1.0 / jnp.sqrt(jnp.float32(first))
        # Stored already transposed: (in, out)
        w = jax.random.uniform(kw, (first, second), jnp.float32, -bound, bound)
        b = jax.random.uniform(kb, (1, second), jnp.float32, -bound, bound)
        params.append((w, b))
    return params


def reference_forward(x_i, x_j, params):
    """Plain-JAX reference matching the PyTorch eval-mode forward."""
    x1 = jnp.concatenate([x_i, x_j], axis=-1)
    x2 = jnp.concatenate([x_j, x_i], axis=-1)
    for (w, b) in params[:-1]:
        x1 = jax.nn.relu(x1 @ w + b)
        x2 = jax.nn.relu(x2 @ w + b)
    w, b = params[-1]
    x1 = x1 @ w + b
    x2 = x2 @ w + b
    return (x1 + x2) / 2.0


if __name__ == "__main__":
    in_channels = 16      # per-node feature dim (logical concat -> 32)
    hidden_channels = 32
    out_channels = 8
    num_layers = 3

    key = jax.random.PRNGKey(0)
    k_i, k_j, k_p = jax.random.split(key, 3)
    params = init_params(k_p, in_channels, hidden_channels, out_channels, num_layers)

    # Small shape consistent with the module.
    N = 8
    x_i = jax.random.normal(k_i, (N, in_channels), jnp.float32)
    x_j = jax.random.normal(k_j, (N, in_channels), jnp.float32)
    out = jax.block_until_ready(mlp_cat_predictor(x_i, x_j, params))
    ref = reference_forward(x_i, x_j, params)
    assert out.shape == (N, out_channels)
    assert jnp.allclose(out, ref, atol=1e-4, rtol=1e-4), "mismatch vs JAX reference (small)"

    # Non-tile-multiple size to exercise the row grid + padding + resident weights.
    N2 = 300
    k_i2, k_j2 = jax.random.split(jax.random.PRNGKey(1))
    x_i2 = jax.random.normal(k_i2, (N2, in_channels), jnp.float32)
    x_j2 = jax.random.normal(k_j2, (N2, in_channels), jnp.float32)
    out2 = jax.block_until_ready(mlp_cat_predictor(x_i2, x_j2, params, tile_n=128))
    ref2 = reference_forward(x_i2, x_j2, params)
    assert out2.shape == (N2, out_channels)
    assert jnp.allclose(out2, ref2, atol=1e-4, rtol=1e-4), "mismatch vs JAX reference (tiled)"

    print("KERNEL_OK")
</pallas_src>

<mosaic_0001>
module attributes {stable_mosaic.version = 11 : i64} {
  func.func @mlp_cat_kernel(%arg0: i32, %arg1: memref<8x16xf32, #tpu.memory_space<vmem>>, %arg2: memref<8x16xf32, #tpu.memory_space<vmem>>, %arg3: memref<16x32xf32, #tpu.memory_space<vmem>>, %arg4: memref<16x32xf32, #tpu.memory_space<vmem>>, %arg5: memref<1x32xf32, #tpu.memory_space<vmem>>, %arg6: memref<32x32xf32, #tpu.memory_space<vmem>>, %arg7: memref<1x32xf32, #tpu.memory_space<vmem>>, %arg8: memref<32x8xf32, #tpu.memory_space<vmem>>, %arg9: memref<1x8xf32, #tpu.memory_space<vmem>>, %arg10: memref<8x8xf32, #tpu.memory_space<vmem>>) attributes {dimension_semantics = [#tpu.dimension_semantics<parallel>], iteration_bounds = array<i64: 1>, scalar_prefetch = 0 : i64, scratch_operands = 0 : i64, tpu.core_type = #tpu.core_type<tc>, window_params = [{transform_indices = @transform_0, window_bounds = array<i64: 8, 16>}, {transform_indices = @transform_1, window_bounds = array<i64: 8, 16>}, {pipeline_mode = #tpu.pipeline_mode<synchronous>, transform_indices = @transform_2, window_bounds = array<i64: 16, 32>}, {pipeline_mode = #tpu.pipeline_mode<synchronous>, transform_indices = @transform_3, window_bounds = array<i64: 16, 32>}, {pipeline_mode = #tpu.pipeline_mode<synchronous>, transform_indices = @transform_4, window_bounds = array<i64: 1, 32>}, {pipeline_mode = #tpu.pipeline_mode<synchronous>, transform_indices = @transform_5, window_bounds = array<i64: 32, 32>}, {pipeline_mode = #tpu.pipeline_mode<synchronous>, transform_indices = @transform_6, window_bounds = array<i64: 1, 32>}, {pipeline_mode = #tpu.pipeline_mode<synchronous>, transform_indices = @transform_7, window_bounds = array<i64: 32, 8>}, {pipeline_mode = #tpu.pipeline_mode<synchronous>, transform_indices = @transform_8, window_bounds = array<i64: 1, 8>}, {transform_indices = @transform_9, window_bounds = array<i64: 8, 8>}]} {
    %c0 = arith.constant 0 : index
    %c0_0 = arith.constant 0 : index
    %0 = vector.load %arg1[%c0, %c0_0] : memref<8x16xf32, #tpu.memory_space<vmem>>, vector<8x16xf32>
    %c0_1 = arith.constant 0 : index
    %c0_2 = arith.constant 0 : index
    %1 = vector.load %arg2[%c0_1, %c0_2] : memref<8x16xf32, #tpu.memory_space<vmem>>, vector<8x16xf32>
    %2 = arith.addf %0, %1 : vector<8x16xf32>
    %3 = arith.subf %0, %1 : vector<8x16xf32>
    %c0_3 = arith.constant 0 : index
    %c0_4 = arith.constant 0 : index
    %4 = vector.load %arg3[%c0_3, %c0_4] : memref<16x32xf32, #tpu.memory_space<vmem>>, vector<16x32xf32>
    %cst = arith.constant dense<0.000000e+00> : vector<8x32xf32>
    %5 = tpu.matmul %2, %4, %cst {dimension_numbers = #tpu.dot_dimension_numbers<[1], [0], [0], [1], [0, 0, 1, 1], [], []>} : vector<8x16xf32>, vector<16x32xf32>, vector<8x32xf32> -> vector<8x32xf32>
    %c0_5 = arith.constant 0 : index
    %c0_6 = arith.constant 0 : index
    %6 = vector.load %arg4[%c0_5, %c0_6] : memref<16x32xf32, #tpu.memory_space<vmem>>, vector<16x32xf32>
    %cst_7 = arith.constant dense<0.000000e+00> : vector<8x32xf32>
    %7 = tpu.matmul %3, %6, %cst_7 {dimension_numbers = #tpu.dot_dimension_numbers<[1], [0], [0], [1], [0, 0, 1, 1], [], []>} : vector<8x16xf32>, vector<16x32xf32>, vector<8x32xf32> -> vector<8x32xf32>
    %c0_8 = arith.constant 0 : index
    %c0_9 = arith.constant 0 : index
    %8 = vector.load %arg5[%c0_8, %c0_9] : memref<1x32xf32, #tpu.memory_space<vmem>>, vector<1x32xf32>
    %9 = arith.addf %5, %7 : vector<8x32xf32>
    %10 = vector.broadcast %8 : vector<1x32xf32> to vector<8x32xf32>
    %11 = arith.addf %9, %10 : vector<8x32xf32>
    %cst_10 = arith.constant 0.000000e+00 : f32
    %12 = vector.broadcast %cst_10 : f32 to vector<8x32xf32>
    %13 = arith.maximumf %11, %12 : vector<8x32xf32>
    %14 = arith.subf %5, %7 : vector<8x32xf32>
    %15 = vector.broadcast %8 : vector<1x32xf32> to vector<8x32xf32>
    %16 = arith.addf %14, %15 : vector<8x32xf32>
    %cst_11 = arith.constant 0.000000e+00 : f32
    %17 = vector.broadcast %cst_11 : f32 to vector<8x32xf32>
    %18 = arith.maximumf %16, %17 : vector<8x32xf32>
    %19 = tpu.concatenate %13, %18 in 0 : vector<8x32xf32>, vector<8x32xf32> -> vector<16x32xf32>
    %c0_12 = arith.constant 0 : index
    %c0_13 = arith.constant 0 : index
    %20 = vector.load %arg6[%c0_12, %c0_13] : memref<32x32xf32, #tpu.memory_space<vmem>>, vector<32x32xf32>
    %cst_14 = arith.constant dense<0.000000e+00> : vector<16x32xf32>
    %21 = tpu.matmul %19, %20, %cst_14 {dimension_numbers = #tpu.dot_dimension_numbers<[1], [0], [0], [1], [0, 0, 1, 1], [], []>} : vector<16x32xf32>, vector<32x32xf32>, vector<16x32xf32> -> vector<16x32xf32>
    %c0_15 = arith.constant 0 : index
    %c0_16 = arith.constant 0 : index
    %22 = vector.load %arg7[%c0_15, %c0_16] : memref<1x32xf32, #tpu.memory_space<vmem>>, vector<1x32xf32>
    %23 = vector.broadcast %22 : vector<1x32xf32> to vector<16x32xf32>
    %24 = arith.addf %21, %23 : vector<16x32xf32>
    %cst_17 = arith.constant 0.000000e+00 : f32
    %25 = vector.broadcast %cst_17 : f32 to vector<16x32xf32>
    %26 = arith.maximumf %24, %25 : vector<16x32xf32>
    %c0_18 = arith.constant 0 : index
    %c0_19 = arith.constant 0 : index
    %27 = vector.load %arg8[%c0_18, %c0_19] : memref<32x8xf32, #tpu.memory_space<vmem>>, vector<32x8xf32>
    %cst_20 = arith.constant dense<0.000000e+00> : vector<16x8xf32>
    %28 = tpu.matmul %26, %27, %cst_20 {dimension_numbers = #tpu.dot_dimension_numbers<[1], [0], [0], [1], [0, 0, 1, 1], [], []>} : vector<16x32xf32>, vector<32x8xf32>, vector<16x8xf32> -> vector<16x8xf32>
    %c0_21 = arith.constant 0 : index
    %c0_22 = arith.constant 0 : index
    %29 = vector.load %arg9[%c0_21, %c0_22] : memref<1x8xf32, #tpu.memory_space<vmem>>, vector<1x8xf32>
    %30 = vector.broadcast %29 : vector<1x8xf32> to vector<16x8xf32>
    %31 = arith.addf %28, %30 : vector<16x8xf32>
    %32 = vector.extract_strided_slice %31 {offsets = [0, 0], sizes = [8, 8], strides = [1, 1]} : vector<16x8xf32> to vector<8x8xf32>
    %33 = vector.extract_strided_slice %31 {offsets = [8, 0], sizes = [8, 8], strides = [1, 1]} : vector<16x8xf32> to vector<8x8xf32>
    %34 = arith.addf %32, %33 : vector<8x8xf32>
    %cst_23 = arith.constant 5.000000e-01 : f32
    %35 = vector.broadcast %cst_23 : f32 to vector<8x8xf32>
    %36 = arith.mulf %34, %35 : vector<8x8xf32>
    %c0_24 = arith.constant 0 : index
    %c0_25 = arith.constant 0 : index
    %37 = vector.load %arg10[%c0_24, %c0_25] : memref<8x8xf32, #tpu.memory_space<vmem>>, vector<8x8xf32>
    tpu.vector_store %arg10[%c0_24, %c0_25], %36 {strides = array<i32>} : memref<8x8xf32, #tpu.memory_space<vmem>>, vector<8x8xf32>,
    return
  }
  func.func @transform_0(%arg0: i32) -> (i32, i32) {
    %c0_i32 = arith.constant 0 : i32
    %c0_i32_0 = arith.constant 0 : i32
    return %arg0, %c0_i32 : i32, i32
  }
  func.func @transform_1(%arg0: i32) -> (i32, i32) {
    %c0_i32 = arith.constant 0 : i32
    %c0_i32_0 = arith.constant 0 : i32
    return %arg0, %c0_i32 : i32, i32
  }
  func.func @transform_2(%arg0: i32) -> (i32, i32) {
    %c0_i32 = arith.constant 0 : i32
    %c0_i32_0 = arith.constant 0 : i32
    %c0_i32_1 = arith.constant 0 : i32
    return %c0_i32, %c0_i32_0 : i32, i32
  }
  func.func @transform_3(%arg0: i32) -> (i32, i32) {
    %c0_i32 = arith.constant 0 : i32
    %c0_i32_0 = arith.constant 0 : i32
    %c0_i32_1 = arith.constant 0 : i32
    return %c0_i32, %c0_i32_0 : i32, i32
  }
  func.func @transform_4(%arg0: i32) -> (i32, i32) {
    %c0_i32 = arith.constant 0 : i32
    %c0_i32_0 = arith.constant 0 : i32
    %c0_i32_1 = arith.constant 0 : i32
    return %c0_i32, %c0_i32_0 : i32, i32
  }
  func.func @transform_5(%arg0: i32) -> (i32, i32) {
    %c0_i32 = arith.constant 0 : i32
    %c0_i32_0 = arith.constant 0 : i32
    %c0_i32_1 = arith.constant 0 : i32
    return %c0_i32, %c0_i32_0 : i32, i32
  }
  func.func @transform_6(%arg0: i32) -> (i32, i32) {
    %c0_i32 = arith.constant 0 : i32
    %c0_i32_0 = arith.constant 0 : i32
    %c0_i32_1 = arith.constant 0 : i32
    return %c0_i32, %c0_i32_0 : i32, i32
  }
  func.func @transform_7(%arg0: i32) -> (i32, i32) {
    %c0_i32 = arith.constant 0 : i32
    %c0_i32_0 = arith.constant 0 : i32
    %c0_i32_1 = arith.constant 0 : i32
    return %c0_i32, %c0_i32_0 : i32, i32
  }
  func.func @transform_8(%arg0: i32) -> (i32, i32) {
    %c0_i32 = arith.constant 0 : i32
    %c0_i32_0 = arith.constant 0 : i32
    %c0_i32_1 = arith.constant 0 : i32
    return %c0_i32, %c0_i32_0 : i32, i32
  }
  func.func @transform_9(%arg0: i32) -> (i32, i32) {
    %c0_i32 = arith.constant 0 : i32
    %c0_i32_0 = arith.constant 0 : i32
    return %arg0, %c0_i32 : i32, i32
  }
}

</mosaic_0001>

<bundles_post_ra>
// kernel: tpu_custom_call.1
= control target key start
LH: loop header
LB: loop body
LE: loop exit
PB: predicated region body
PF: predicated region fallthrough
CT: control target
= control target key end

     0   :  { %14 = vsyncpa [#allocation3], 0  ;;  %s475_s0 = inlined_call_operand.vmem [shape: f32[8,16], index: 0, kind: input, shape index: {}]   ;;  %s476_s1 = inlined_call_operand.hbm [shape: f32[8,16], index: 1, kind: input, shape index: {}]   ;;  %s477_s2 = inlined_call_operand.hbm [shape: f32[16,32], index: 2, kind: input, shape index: {}]   ;;  %s478_s3 = inlined_call_operand.hbm [shape: f32[16,32], index: 3, kind: input, shape index: {}]   ;;  %s479_s4 = inlined_call_operand.vmem [shape: f32[1,32], index: 4, kind: input, shape index: {}]   ;;  %s480_s5 = inlined_call_operand.vmem [shape: f32[32,32], index: 5, kind: input, shape index: {}]   ;;  %s481_s6 = inlined_call_operand.vmem [shape: f32[1,32], index: 6, kind: input, shape index: {}]   ;;  %s482_s7 = inlined_call_operand.vmem [shape: f32[32,8], index: 7, kind: input, shape index: {}]   ;;  %s483_s8 = inlined_call_operand.vmem [shape: f32[1,8], index: 8, kind: input, shape index: {}]   ;;  %s484_s9 = inlined_call_operand.hbm [shape: f32[8,8], index: 9, kind: output, shape index: {}]  }
   0x1   :  { %15 = vsyncpa [#allocation6], 0  ;;  %s34_s11 = sshll.u32 %s477_s2, 4  ;;  %s35_s11 = int_to_ptr.hbm [resolvable:$true] %s34_s11 }
   0x2   :  { %16 = vsyncpa [#allocation4], 0  ;;  %s367_s12 = smov [#allocation5]   ;;  %s24_s16 = sshll.u32 %s476_s1, 4  ;;  %s25_s16 = int_to_ptr.hbm [resolvable:$true] %s24_s16 }
   0x3   :  { %s36_s13 = sshll.u32 %s367_s12, 4  ;;  %s368_s17 = smov 128   ;;  %s37_s13 = int_to_ptr.vmem [resolvable:$true] %s36_s13 }
   0x4   :  { %s369_s18 = smov 8   ;;  %s370_s19 = smov [#allocation2]  }
   0x5   :  { %42 = dma.hbm_to_vmem [thread:$0]  %s35_s11, 256, %s37_s13, [#allocation6], %s368_s17, %s368_s17, %s369_s18  }
   0x6   :  { %s26_s20 = sshll.u32 %s370_s19, 4  ;;  %s47_s23 = sshll.u32 %s478_s3, 4  ;;  %s27_s20 = int_to_ptr.vmem [resolvable:$true] %s26_s20  ;;  %s48_s23 = int_to_ptr.hbm [resolvable:$true] %s47_s23 }
   0x7   :  { %29 = dma.hbm_to_vmem [thread:$0]  %s25_s16, 128, %s27_s20, [#allocation3]  }
   0x8   :  { %s371_s2 = smov [#allocation7]  }
   0x9   :  { %s49_s24 = sshll.u32 %s371_s2, 4  ;;  %s50_s24 = int_to_ptr.vmem [resolvable:$true] %s49_s24 }
   0xa   :  { %55 = dma.hbm_to_vmem [thread:$0]  %s48_s23, 256, %s50_s24, [#allocation6], %s368_s17, %s368_s17, %s369_s18  }
   0xb   :  { %361 = dma.done.wait [#allocation3], 128  }
   0xc   :  { %362 = vsyncadd [#allocation3], 4294967168 }
   0xd   :  { %363 = dma.done.wait [#allocation6], 512  }
   0xe   :  { %364 = vsyncadd [#allocation6], 4294966784  ;;  %v83_v0 = vld [vmem:[#allocation5 + $0x8] sm:$0xff]  ;;  %v109_v1 = vld [vmem:[#allocation7 + $0x8] sm:$0xff]  ;;  %vm84_vm0 = vcmask 130048   ;;  %vm151_vm1 = vcmask 261120  }
   0xf   :  { %v82_v2 = vld [vmem:[#allocation5] sm:$0xff]  ;;  %102 = vmatpush.msra.mxu0 %v83_v0  ;;  %127 = vmatpush.msra.mxu1 %v109_v1  ;;  %v108_v3 = vld [vmem:[#allocation7] sm:$0xff]  ;;  %v78_v4 = vld [vmem:[%s475_s0] sm:$0xff]  ;;  %s231_s24 = sshll.u32 %s484_s9, 4  ;;  %vm222_vm2 = vcmask 64512   ;;  %s232_s24 = int_to_ptr.hbm [resolvable:$true] %s231_s24 }
  0x10   :  { %v79_v5 = vld [vmem:[#allocation2] sm:$0xff]  ;;  %v146_v8 = vld [vmem:[%s480_s5 + $0x18] sm:$0xff]  ;;  %v145_v9 = vld [vmem:[%s480_s5 + $0x10] sm:$0xff] }
  0x11   :  { %v80_v6 = vadd.f32 %v79_v5, %v78_v4  ;;  %v81_v7 = vsub.f32 %v78_v4, %v79_v5  ;;  %103 = vmatpush.msra.mxu0 %v82_v2  ;;  %128 = vmatpush.msra.mxu1 %v108_v3  ;;  %v144_v10 = vld [vmem:[%s480_s5 + $0x8] sm:$0xff]  ;;  %v143_v11 = vld [vmem:[%s480_s5] sm:$0xff]  ;;  %v186_v12 = vld [vmem:[%s482_s7 + $0x18] sm:$0xff] }
  0x12   :  { %248 = vmatpush.msra.mxu2 %v146_v8  ;;  %252 = vmatpush.msra.mxu3 %v186_v12  ;;  %v262_v13 = vld [vmem:[%s479_s4] ss:$0 sm:$0xff]  ;;  %v185_v22 = vld [vmem:[%s482_s7 + $0x10] sm:$0xff]  ;;  %v184_v23 = vld [vmem:[%s482_s7 + $0x8] sm:$0xff] }
  0x13   :  { %242 = vmatmul.msk.f32.vlgmr.msra.gmra.mxu0 %vm84_vm0, %v80_v6  ;;  %243 = vmatmul.msk.f32.vlgmr.msra.gmra.mxu1 %vm84_vm0, %v81_v7  ;;  %v183_v24 = vld [vmem:[%s482_s7] sm:$0xff]  ;;  %s372_s7 = smov [#allocation8]  }
  0x14   :  { %170 = vmatpush.msrb.mxu0 %v146_v8  ;;  %249 = vmatpush.msra.mxu2 %v145_v9  ;;  %v263_v25 = vld [vmem:[%s481_s6] ss:$0 sm:$0xff]  ;;  %s229_s6 = sshll.u32 %s372_s7, 4  ;;  %s230_s6 = int_to_ptr.vmem [resolvable:$true] %s229_s6 }
  0x15   :  { %209 = vmatpush.msrb.mxu1 %v186_v12  ;;  %253 = vmatpush.msra.mxu3 %v185_v22  ;;  %v264_v32 = vld [vmem:[%s483_s8] ss:$0 sm:$0xff] }
  0x16   :  { %171 = vmatpush.msrb.mxu0 %v145_v9  ;;  %250 = vmatpush.msra.mxu2 %v144_v10 }
  0x17   :  { %210 = vmatpush.msrb.mxu1 %v185_v22  ;;  %254 = vmatpush.msra.mxu3 %v184_v23 }
  0x18   :  { %172 = vmatpush.msrb.mxu0 %v144_v10  ;;  %251 = vmatpush.msra.mxu2 %v143_v11 }
  0x19   :  { %211 = vmatpush.msrb.mxu1 %v184_v23  ;;  %255 = vmatpush.msra.mxu3 %v183_v24 }
  0x1a   :  { %173 = vmatpush.msrb.mxu0 %v143_v11 }
  0x1b   :  { %212 = vmatpush.msrb.mxu1 %v183_v24 }
  0x90   :  { %v105_v14 = vpop.f32.mrf.mxu0  ;;  %v130_v15 = vpop.f32.mrf.mxu1 }
  0x91   :  { %v134_v16 = vadd.f32 %v130_v15, %v105_v14  ;;  %v140_v17 = vsub.f32 %v105_v14, %v130_v15 }
  0x93   :  { %v138_v18 = vadd.f32 %v262_v13, %v134_v16  ;;  %v141_v19 = vadd.f32 %v262_v13, %v140_v17 }
  0x95   :  { %v139_v20 = vmax.f32 %v138_v18, 0.0  ;;  %v142_v21 = vmax.f32 %v141_v19, 0.0 }
  0x97   :  { %244 = vmatmul.msk.f32.vlgmr.msrb.gmra.mxu0 %vm151_vm1, %v139_v20  ;;  %245 = vmatmul.msk.f32.vlgmr.msra.gmra.mxu2 %vm151_vm1, %v142_v21 }
 0x114   :  { %v175_v26 = vpop.f32.mrf.mxu0 }
 0x115   :  { %v176_v27 = vadd.f32 %v263_v25, %v175_v26 }
 0x117   :  { %v181_v28 = vmax.f32 %v176_v27, 0.0 }
 0x119   :  { %246 = vmatmul.msk.f32.vlgmr.msrb.gmra.mxu1 %vm151_vm1, %v181_v28 }
 0x11a   :  { %v178_v29 = vpop.f32.mrf.mxu2 }
 0x11b   :  { %v179_v30 = vadd.f32 %v263_v25, %v178_v29 }
 0x11d   :  { %v182_v31 = vmax.f32 %v179_v30, 0.0 }
 0x11f   :  { %247 = vmatmul.msk.f32.vlgmr.msra.gmra.mxu3 %vm151_vm1, %v182_v31 }
 0x196   :  { %v214_v33 = vpop.f32.mrf.mxu1 }
 0x197   :  { %v215_v35 = vadd.f32 %v264_v32, %v214_v33 }
 0x1a2   :  { %v217_v34 = vpop.f32.mrf.mxu3 }
 0x1a3   :  { %v218_v36 = vadd.f32 %v264_v32, %v217_v34 }
 0x1a5   :  { %v220_v37 = vadd.f32 %v218_v36, %v215_v35 }
 0x1a7   :  { %v221_v38 = vmul.f32 0.5, %v220_v37 }
 0x1a9   :  { %223 = vst.msk [vmem:[#allocation8] sm:$0xff] %vm222_vm2, %v221_v38 }
 0x1aa   :  { %234 = dma.vmem_to_hbm [thread:$0]  %s230_s6, 128, %s232_s24, [#allocation4]  }
 0x1ab   :  { %365 = dma.done.wait [#allocation4], 128  }
 0x1ac   :  { %366 = vsyncadd [#allocation4], 4294967168 }
 0x1ad   :  { %239 = vsyncpa [#allocation3], 1 }
 0x1ae   :  { %240 = vsyncpa [#allocation6], 1 }
 0x1af   :  { %241 = vsyncpa [#allocation4], 1 }

</bundles_post_ra>
